<compile_context>
chip_gen: v7x
topology: tpu7x:2x2x1
jax: 0.10.0
libtpu: 0.0.40
codegen_flags: <defaults>
</compile_context>

<pallas_src>
import functools
import math

import jax
import jax.numpy as jnp
from jax import lax
from jax.experimental import pallas as pl
from jax.experimental.pallas import tpu as pltpu

_VMEM_LIMIT = 48 * 1024 * 1024  # fits v7x (64 MiB phys) and v5e/v6e


def _pick_tile(n, target):
    """Largest convenient tile: full dim if small, else `target` when it divides."""
    if n <= target:
        return n
    return target if n % target == 0 else n


# ----------------------------------------------------------------------------
# Fused attention block kernel:
#   QKV projection + flash attention (online softmax) + output projection
#   + residual add + LayerNorm, all in one pallas_call.
# grid = (B, num_q_tiles, num_kv_tiles)
# ----------------------------------------------------------------------------

def _attn_ln_kernel(xq_ref, xkv_ref, wq_ref, wkv_ref, wo_ref, g_ref, beta_ref,
                    o_ref,
                    q_scr, k_scr, v_scr, m_scr, l_scr, acc_scr,
                    *, causal, scale, eps, tq, tk):
    qi = pl.program_id(1)
    ki = pl.program_id(2)
    d = k_scr.shape[-1]

    # ---- hoisted projections -------------------------------------------
    @pl.when(ki == 0)
    def _():
        # Q projection for this q-tile (once per (b, qi)); pre-scaled.
        q = jnp.dot(xq_ref[0], wq_ref[...], preferred_element_type=jnp.float32)
        q_scr[...] = (q * scale).astype(q_scr.dtype)
        # Reset online-softmax state.
        m_scr[...] = jnp.full(m_scr.shape, -jnp.inf, jnp.float32)
        l_scr[...] = jnp.zeros(l_scr.shape, jnp.float32)
        acc_scr[...] = jnp.zeros(acc_scr.shape, jnp.float32)

    @pl.when(qi == 0)
    def _():
        # Fused K/V projection for this kv-tile, cached per batch and reused
        # by every q-tile (hoisted out of the q loop).
        kv = jnp.dot(xkv_ref[0], wkv_ref[...], preferred_element_type=jnp.float32)
        off = pl.multiple_of(ki * tk, tk)
        k_scr[pl.ds(off, tk), :] = kv[:, :d].astype(k_scr.dtype)
        v_scr[pl.ds(off, tk), :] = kv[:, d:].astype(v_scr.dtype)

    # ---- online-softmax attention over this kv tile ----------------------
    off = pl.multiple_of(ki * tk, tk)
    k_t = k_scr[pl.ds(off, tk), :]                       # (TK, D)
    v_t = v_scr[pl.ds(off, tk), :]                       # (TK, D)

    s = lax.dot_general(q_scr[...], k_t, (((1,), (1,)), ((), ())),
                        preferred_element_type=jnp.float32)   # (TQ, TK)

    if causal:
        row = lax.broadcasted_iota(jnp.int32, s.shape, 0) + qi * tq
        col = lax.broadcasted_iota(jnp.int32, s.shape, 1) + ki * tk
        keep = col <= row
        s = jnp.where(keep, s, -1e30)

    m_prev = m_scr[...]
    m_new = jnp.maximum(m_prev, jnp.max(s, axis=-1, keepdims=True))
    alpha = jnp.exp(m_prev - m_new)
    p = jnp.exp(s - m_new)
    if causal:
        p = jnp.where(keep, p, 0.0)

    l_scr[...] = alpha * l_scr[...] + jnp.sum(p, axis=-1, keepdims=True)
    acc_scr[...] = alpha * acc_scr[...] + jnp.dot(
        p.astype(v_scr.dtype), v_t, preferred_element_type=jnp.float32)
    m_scr[...] = m_new

    # ---- epilogue: output projection + residual + LayerNorm --------------
    @pl.when(ki == pl.num_programs(2) - 1)
    def _():
        attn = acc_scr[...] * pl.reciprocal(l_scr[...], approx=True)
        out = jnp.dot(attn.astype(wo_ref.dtype), wo_ref[...],
                      preferred_element_type=jnp.float32)
        h = out + xq_ref[0].astype(jnp.float32)          # post-LN residual
        mu = jnp.mean(h, axis=-1, keepdims=True)
        var = jnp.mean(jnp.square(h - mu), axis=-1, keepdims=True)
        y = (h - mu) * lax.rsqrt(var + eps)
        o_ref[0] = (y * g_ref[...].astype(jnp.float32)
                    + beta_ref[...].astype(jnp.float32)).astype(o_ref.dtype)


def fused_attention_ln(x_q, x_kv, wq, wkv, wo, gamma, beta, *, causal,
                       eps=1e-5, tq=128, tk=128):
    B, Sq, D = x_q.shape
    _, Skv, _ = x_kv.shape
    TQ = _pick_tile(Sq, tq)
    TK = _pick_tile(Skv, tk)

    kernel = functools.partial(_attn_ln_kernel, causal=causal,
                               scale=1.0 / math.sqrt(D), eps=eps, tq=TQ, tk=TK)
    return pl.pallas_call(
        kernel,
        out_shape=jax.ShapeDtypeStruct((B, Sq, D), x_q.dtype),
        grid=(B, Sq // TQ, Skv // TK),
        in_specs=[
            pl.BlockSpec((1, TQ, D), lambda b, qi, ki: (b, qi, 0)),
            pl.BlockSpec((1, TK, D), lambda b, qi, ki: (b, ki, 0)),
            pl.BlockSpec((D, D), lambda b, qi, ki: (0, 0)),
            pl.BlockSpec((D, 2 * D), lambda b, qi, ki: (0, 0)),
            pl.BlockSpec((D, D), lambda b, qi, ki: (0, 0)),
            pl.BlockSpec((1, D), lambda b, qi, ki: (0, 0)),
            pl.BlockSpec((1, D), lambda b, qi, ki: (0, 0)),
        ],
        out_specs=pl.BlockSpec((1, TQ, D), lambda b, qi, ki: (b, qi, 0)),
        scratch_shapes=[
            pltpu.VMEM((TQ, D), x_q.dtype),      # Q cache (per q-tile)
            pltpu.VMEM((Skv, D), x_kv.dtype),    # K cache (per batch, hoisted)
            pltpu.VMEM((Skv, D), x_kv.dtype),    # V cache (per batch, hoisted)
            pltpu.VMEM((TQ, 1), jnp.float32),    # running max
            pltpu.VMEM((TQ, 1), jnp.float32),    # running sum
            pltpu.VMEM((TQ, D), jnp.float32),    # output accumulator
        ],
        compiler_params=pltpu.CompilerParams(
            # qi must be "arbitrary": the per-batch K/V cache is filled at qi==0.
            dimension_semantics=("parallel", "arbitrary", "arbitrary"),
            vmem_limit_bytes=_VMEM_LIMIT,
        ),
    )(x_q, x_kv, wq, wkv, wo, gamma, beta)


# ----------------------------------------------------------------------------
# Fused FFN block kernel:
#   relu(x @ w1 + b1) @ w2 + b2 (tiled over the hidden dim F, f32 accumulator)
#   + residual add + LayerNorm.
# grid = (B, num_s_tiles, num_f_tiles)
# ----------------------------------------------------------------------------

def _ffn_ln_kernel(x_ref, w1_ref, b1_ref, w2_ref, b2_ref, g_ref, beta_ref,
                   o_ref, acc_scr, *, eps):
    fi = pl.program_id(2)

    @pl.when(fi == 0)
    def _():
        acc_scr[...] = jnp.zeros(acc_scr.shape, jnp.float32)

    x = x_ref[0]                                                     # (TS, D)
    h = jnp.dot(x, w1_ref[...], preferred_element_type=jnp.float32)
    h = jnp.maximum(h + b1_ref[...].astype(jnp.float32), 0.0)
    acc_scr[...] += jnp.dot(h.astype(x.dtype), w2_ref[...],
                            preferred_element_type=jnp.float32)

    @pl.when(fi == pl.num_programs(2) - 1)
    def _():
        y = acc_scr[...] + b2_ref[...].astype(jnp.float32)
        h_res = y + x.astype(jnp.float32)                 # post-LN residual
        mu = jnp.mean(h_res, axis=-1, keepdims=True)
        var = jnp.mean(jnp.square(h_res - mu), axis=-1, keepdims=True)
        yn = (h_res - mu) * lax.rsqrt(var + eps)
        o_ref[0] = (yn * g_ref[...].astype(jnp.float32)
                    + beta_ref[...].astype(jnp.float32)).astype(o_ref.dtype)


def fused_ffn_ln(x, w1, b1, w2, b2, gamma, beta, *, eps=1e-5, ts=128, tf=512):
    B, S, D = x.shape
    F = w1.shape[1]
    TS = _pick_tile(S, ts)
    TF = _pick_tile(F, tf)

    kernel = functools.partial(_ffn_ln_kernel, eps=eps)
    return pl.pallas_call(
        kernel,
        out_shape=jax.ShapeDtypeStruct((B, S, D), x.dtype),
        grid=(B, S // TS, F // TF),
        in_specs=[
            pl.BlockSpec((1, TS, D), lambda b, si, fi: (b, si, 0)),
            pl.BlockSpec((D, TF), lambda b, si, fi: (0, fi)),
            pl.BlockSpec((1, TF), lambda b, si, fi: (0, fi)),
            pl.BlockSpec((TF, D), lambda b, si, fi: (fi, 0)),
            pl.BlockSpec((1, D), lambda b, si, fi: (0, 0)),
            pl.BlockSpec((1, D), lambda b, si, fi: (0, 0)),
            pl.BlockSpec((1, D), lambda b, si, fi: (0, 0)),
        ],
        out_specs=pl.BlockSpec((1, TS, D), lambda b, si, fi: (b, si, 0)),
        scratch_shapes=[pltpu.VMEM((TS, D), jnp.float32)],
        compiler_params=pltpu.CompilerParams(
            dimension_semantics=("parallel", "parallel", "arbitrary"),
            vmem_limit_bytes=_VMEM_LIMIT,
        ),
    )(x, w1, b1, w2, b2, gamma, beta)


# ----------------------------------------------------------------------------
# Transformer layers (glue in plain JAX; all compute inside the fused kernels)
# ----------------------------------------------------------------------------

def encoder_layer(p, x, flag):
    del flag  # encoder uses no causal mask
    h = fused_attention_ln(x, x, p["wq"], p["wkv"], p["wo"],
                           p["ln1_g"], p["ln1_b"], causal=False)
    return fused_ffn_ln(h, p["w1"], p["b1"], p["w2"], p["b2"],
                        p["ln2_g"], p["ln2_b"])


def decoder_layer(p, y, enc_out, flag):
    causal = bool(flag)
    h1 = fused_attention_ln(y, y, p["sa_wq"], p["sa_wkv"], p["sa_wo"],
                            p["ln1_g"], p["ln1_b"], causal=causal)
    h2 = fused_attention_ln(h1, enc_out, p["ca_wq"], p["ca_wkv"], p["ca_wo"],
                            p["ln2_g"], p["ln2_b"], causal=False)
    return fused_ffn_ln(h2, p["w1"], p["b1"], p["w2"], p["b2"],
                        p["ln3_g"], p["ln3_b"])


def transformer_forward(params, encoder_input, decoder_input, flag=1):
    encoder_output = encoder_layer(params["encoder"], encoder_input, flag)
    decoder_output = decoder_layer(params["decoder"], decoder_input,
                                   encoder_output, flag)
    return decoder_output


# ----------------------------------------------------------------------------
# Deterministic parameter init (K/V weights pre-fused as (D, 2D))
# ----------------------------------------------------------------------------

def init_params(key, d_model, d_ff):
    ks = jax.random.split(key, 16)

    def w(k, shape, scale=0.02):
        return (scale * jax.random.normal(k, shape)).astype(jnp.float32)

    ones = lambda n: jnp.ones((1, n), jnp.float32)
    zeros = lambda n: jnp.zeros((1, n), jnp.float32)

    enc = {
        "wq": w(ks[0], (d_model, d_model)),
        "wkv": w(ks[1], (d_model, 2 * d_model)),
        "wo": w(ks[2], (d_model, d_model)),
        "w1": w(ks[3], (d_model, d_ff)), "b1": zeros(d_ff),
        "w2": w(ks[4], (d_ff, d_model)), "b2": zeros(d_model),
        "ln1_g": ones(d_model), "ln1_b": zeros(d_model),
        "ln2_g": ones(d_model), "ln2_b": zeros(d_model),
    }
    dec = {
        "sa_wq": w(ks[5], (d_model, d_model)),
        "sa_wkv": w(ks[6], (d_model, 2 * d_model)),
        "sa_wo": w(ks[7], (d_model, d_model)),
        "ca_wq": w(ks[8], (d_model, d_model)),
        "ca_wkv": w(ks[9], (d_model, 2 * d_model)),
        "ca_wo": w(ks[10], (d_model, d_model)),
        "w1": w(ks[11], (d_model, d_ff)), "b1": zeros(d_ff),
        "w2": w(ks[12], (d_ff, d_model)), "b2": zeros(d_model),
        "ln1_g": ones(d_model), "ln1_b": zeros(d_model),
        "ln2_g": ones(d_model), "ln2_b": zeros(d_model),
        "ln3_g": ones(d_model), "ln3_b": zeros(d_model),
    }
    return {"encoder": enc, "decoder": dec}


if __name__ == "__main__":
    # Small but lane-dense config (D multiple of 128 per perf feedback).
    B, S_ENC, S_DEC, D_MODEL, D_FF = 2, 8, 8, 128, 256

    key = jax.random.PRNGKey(0)
    k_params, k_enc_in, k_dec_in = jax.random.split(key, 3)

    params = init_params(k_params, D_MODEL, D_FF)
    encoder_input = jax.random.normal(k_enc_in, (B, S_ENC, D_MODEL), jnp.float32)
    decoder_input = jax.random.normal(k_dec_in, (B, S_DEC, D_MODEL), jnp.float32)

    out = transformer_forward(params, encoder_input, decoder_input, flag=1)
    out = jax.block_until_ready(out)
    assert out.shape == (B, S_DEC, D_MODEL) and out.dtype == jnp.float32
    assert bool(jnp.all(jnp.isfinite(out)))
    print("KERNEL_OK")
</pallas_src>

<mosaic_0001>
module attributes {stable_mosaic.version = 11 : i64} {
  func.func @_attn_ln_kernel(%arg0: i32, %arg1: i32, %arg2: i32, %arg3: memref<1x8x128xf32, #tpu.memory_space<vmem>>, %arg4: memref<1x8x128xf32, #tpu.memory_space<vmem>>, %arg5: memref<128x128xf32, #tpu.memory_space<vmem>>, %arg6: memref<128x256xf32, #tpu.memory_space<vmem>>, %arg7: memref<128x128xf32, #tpu.memory_space<vmem>>, %arg8: memref<1x128xf32, #tpu.memory_space<vmem>>, %arg9: memref<1x128xf32, #tpu.memory_space<vmem>>, %arg10: memref<1x8x128xf32, #tpu.memory_space<vmem>>, %arg11: memref<8x128xf32, #tpu.memory_space<vmem>>, %arg12: memref<8x128xf32, #tpu.memory_space<vmem>>, %arg13: memref<8x128xf32, #tpu.memory_space<vmem>>, %arg14: memref<8x1xf32, #tpu.memory_space<vmem>>, %arg15: memref<8x1xf32, #tpu.memory_space<vmem>>, %arg16: memref<8x128xf32, #tpu.memory_space<vmem>>) attributes {dimension_semantics = [#tpu.dimension_semantics<parallel>, #tpu.dimension_semantics<arbitrary>, #tpu.dimension_semantics<arbitrary>], iteration_bounds = array<i64: 2, 1, 1>, scalar_prefetch = 0 : i64, scratch_operands = 6 : i64, tpu.core_type = #tpu.core_type<tc>, window_params = [{transform_indices = @transform_0, window_bounds = array<i64: 1, 8, 128>}, {transform_indices = @transform_1, window_bounds = array<i64: 1, 8, 128>}, {pipeline_mode = #tpu.pipeline_mode<synchronous>, transform_indices = @transform_2, window_bounds = array<i64: 128, 128>}, {pipeline_mode = #tpu.pipeline_mode<synchronous>, transform_indices = @transform_3, window_bounds = array<i64: 128, 256>}, {pipeline_mode = #tpu.pipeline_mode<synchronous>, transform_indices = @transform_4, window_bounds = array<i64: 128, 128>}, {pipeline_mode = #tpu.pipeline_mode<synchronous>, transform_indices = @transform_5, window_bounds = array<i64: 1, 128>}, {pipeline_mode = #tpu.pipeline_mode<synchronous>, transform_indices = @transform_6, window_bounds = array<i64: 1, 128>}, {transform_indices = @transform_7, window_bounds = array<i64: 1, 8, 128>}]} {
    %c0_i32 = arith.constant 0 : i32
    %0 = arith.cmpi eq, %arg2, %c0_i32 : i32
    %1 = arith.extui %0 : i1 to i32
    %c0_i32_0 = arith.constant 0 : i32
    %2 = arith.cmpi ne, %1, %c0_i32_0 : i32
    scf.if %2 {
      %c0_23 = arith.constant 0 : index
      %c0_24 = arith.constant 0 : index
      %c0_25 = arith.constant 0 : index
      %39 = vector.load %arg3[%c0_23, %c0_24, %c0_25] : memref<1x8x128xf32, #tpu.memory_space<vmem>>, vector<1x8x128xf32>
      %40 = vector.shape_cast %39 : vector<1x8x128xf32> to vector<8x128xf32>
      %c0_26 = arith.constant 0 : index
      %c0_27 = arith.constant 0 : index
      %41 = vector.load %arg5[%c0_26, %c0_27] : memref<128x128xf32, #tpu.memory_space<vmem>>, vector<128x128xf32>
      %cst_28 = arith.constant dense<0.000000e+00> : vector<8x128xf32>
      %42 = tpu.matmul %40, %41, %cst_28 {dimension_numbers = #tpu.dot_dimension_numbers<[1], [0], [0], [1], [0, 0, 1, 1], [], []>} : vector<8x128xf32>, vector<128x128xf32>, vector<8x128xf32> -> vector<8x128xf32>
      %cst_29 = arith.constant 0.0883883461 : f32
      %43 = vector.broadcast %cst_29 : f32 to vector<8x128xf32>
      %44 = arith.mulf %42, %43 : vector<8x128xf32>
      %c0_30 = arith.constant 0 : index
      %c0_31 = arith.constant 0 : index
      %45 = vector.load %arg11[%c0_30, %c0_31] : memref<8x128xf32, #tpu.memory_space<vmem>>, vector<8x128xf32>
      tpu.vector_store %arg11[%c0_30, %c0_31], %44 {strides = array<i32>} : memref<8x128xf32, #tpu.memory_space<vmem>>, vector<8x128xf32>,
      %cst_32 = arith.constant 0xFF800000 : f32
      %46 = vector.broadcast %cst_32 : f32 to vector<8x1xf32>
      %c0_33 = arith.constant 0 : index
      %c0_34 = arith.constant 0 : index
      %47 = vector.load %arg14[%c0_33, %c0_34] : memref<8x1xf32, #tpu.memory_space<vmem>>, vector<8x1xf32>
      tpu.vector_store %arg14[%c0_33, %c0_34], %46 {strides = array<i32>} : memref<8x1xf32, #tpu.memory_space<vmem>>, vector<8x1xf32>,
      %cst_35 = arith.constant 0.000000e+00 : f32
      %48 = vector.broadcast %cst_35 : f32 to vector<8x1xf32>
      %c0_36 = arith.constant 0 : index
      %c0_37 = arith.constant 0 : index
      %49 = vector.load %arg15[%c0_36, %c0_37] : memref<8x1xf32, #tpu.memory_space<vmem>>, vector<8x1xf32>
      tpu.vector_store %arg15[%c0_36, %c0_37], %48 {strides = array<i32>} : memref<8x1xf32, #tpu.memory_space<vmem>>, vector<8x1xf32>,
      %cst_38 = arith.constant 0.000000e+00 : f32
      %50 = vector.broadcast %cst_38 : f32 to vector<8x128xf32>
      %c0_39 = arith.constant 0 : index
      %c0_40 = arith.constant 0 : index
      %51 = vector.load %arg16[%c0_39, %c0_40] : memref<8x128xf32, #tpu.memory_space<vmem>>, vector<8x128xf32>
      tpu.vector_store %arg16[%c0_39, %c0_40], %50 {strides = array<i32>} : memref<8x128xf32, #tpu.memory_space<vmem>>, vector<8x128xf32>,
    } else {
    }
    %c0_i32_1 = arith.constant 0 : i32
    %3 = arith.cmpi eq, %arg1, %c0_i32_1 : i32
    %4 = arith.extui %3 : i1 to i32
    %c0_i32_2 = arith.constant 0 : i32
    %5 = arith.cmpi ne, %4, %c0_i32_2 : i32
    scf.if %5 {
      %c0_23 = arith.constant 0 : index
      %c0_24 = arith.constant 0 : index
      %c0_25 = arith.constant 0 : index
      %39 = vector.load %arg4[%c0_23, %c0_24, %c0_25] : memref<1x8x128xf32, #tpu.memory_space<vmem>>, vector<1x8x128xf32>
      %40 = vector.shape_cast %39 : vector<1x8x128xf32> to vector<8x128xf32>
      %c0_26 = arith.constant 0 : index
      %c0_27 = arith.constant 0 : index
      %41 = vector.load %arg6[%c0_26, %c0_27] : memref<128x256xf32, #tpu.memory_space<vmem>>, vector<128x256xf32>
      %cst_28 = arith.constant dense<0.000000e+00> : vector<8x256xf32>
      %42 = tpu.matmul %40, %41, %cst_28 {dimension_numbers = #tpu.dot_dimension_numbers<[1], [0], [0], [1], [0, 0, 1, 1], [], []>} : vector<8x128xf32>, vector<128x256xf32>, vector<8x256xf32> -> vector<8x256xf32>
      %c8_i32_29 = arith.constant 8 : i32
      %43 = arith.muli %arg2, %c8_i32_29 : i32
      %44 = tpu.assume_multiple %43, 8 : i32
      %45 = vector.extract_strided_slice %42 {offsets = [0, 0], sizes = [8, 128], strides = [1, 1]} : vector<8x256xf32> to vector<8x128xf32>
      %46 = arith.index_cast %44 : i32 to index
      %c0_30 = arith.constant 0 : index
      %47 = vector.load %arg12[%46, %c0_30] : memref<8x128xf32, #tpu.memory_space<vmem>>, vector<8x128xf32>
      tpu.vector_store %arg12[%46, %c0_30], %45 {strides = array<i32>} : memref<8x128xf32, #tpu.memory_space<vmem>>, vector<8x128xf32>,
      %48 = vector.extract_strided_slice %42 {offsets = [0, 128], sizes = [8, 128], strides = [1, 1]} : vector<8x256xf32> to vector<8x128xf32>
      %49 = arith.index_cast %44 : i32 to index
      %c0_31 = arith.constant 0 : index
      %50 = vector.load %arg13[%49, %c0_31] : memref<8x128xf32, #tpu.memory_space<vmem>>, vector<8x128xf32>
      tpu.vector_store %arg13[%49, %c0_31], %48 {strides = array<i32>} : memref<8x128xf32, #tpu.memory_space<vmem>>, vector<8x128xf32>,
    } else {
    }
    %c8_i32 = arith.constant 8 : i32
    %6 = arith.muli %arg2, %c8_i32 : i32
    %7 = tpu.assume_multiple %6, 8 : i32
    %8 = arith.index_cast %7 : i32 to index
    %c0 = arith.constant 0 : index
    %9 = vector.load %arg12[%8, %c0] : memref<8x128xf32, #tpu.memory_space<vmem>>, vector<8x128xf32>
    %10 = arith.index_cast %7 : i32 to index
    %c0_3 = arith.constant 0 : index
    %11 = vector.load %arg13[%10, %c0_3] : memref<8x128xf32, #tpu.memory_space<vmem>>, vector<8x128xf32>
    %c0_4 = arith.constant 0 : index
    %c0_5 = arith.constant 0 : index
    %12 = vector.load %arg11[%c0_4, %c0_5] : memref<8x128xf32, #tpu.memory_space<vmem>>, vector<8x128xf32>
    %cst = arith.constant dense<0.000000e+00> : vector<8x8xf32>
    %13 = tpu.matmul %12, %9, %cst {dimension_numbers = #tpu.dot_dimension_numbers<[1], [1], [0], [0], [0, 0, 1, 0], [], []>} : vector<8x128xf32>, vector<8x128xf32>, vector<8x8xf32> -> vector<8x8xf32>
    %c0_6 = arith.constant 0 : index
    %c0_7 = arith.constant 0 : index
    %14 = vector.load %arg14[%c0_6, %c0_7] : memref<8x1xf32, #tpu.memory_space<vmem>>, vector<8x1xf32>
    %cst_8 = arith.constant dense<0xFF800000> : vector<8xf32>
    %15 = vector.multi_reduction <maximumf>, %13, %cst_8 [1] : vector<8x8xf32> to vector<8xf32>
    %16 = vector.shape_cast %15 : vector<8xf32> to vector<8x1xf32>
    %17 = arith.maximumf %14, %16 : vector<8x1xf32>
    %18 = arith.subf %14, %17 : vector<8x1xf32>
    %19 = math.exp %18 : vector<8x1xf32>
    %20 = vector.broadcast %17 : vector<8x1xf32> to vector<8x8xf32>
    %21 = arith.subf %13, %20 : vector<8x8xf32>
    %22 = math.exp %21 : vector<8x8xf32>
    %c0_9 = arith.constant 0 : index
    %c0_10 = arith.constant 0 : index
    %23 = vector.load %arg15[%c0_9, %c0_10] : memref<8x1xf32, #tpu.memory_space<vmem>>, vector<8x1xf32>
    %24 = arith.mulf %19, %23 : vector<8x1xf32>
    %cst_11 = arith.constant dense<0.000000e+00> : vector<8xf32>
    %25 = vector.multi_reduction <add>, %22, %cst_11 [1] : vector<8x8xf32> to vector<8xf32>
    %26 = vector.shape_cast %25 : vector<8xf32> to vector<8x1xf32>
    %27 = arith.addf %24, %26 : vector<8x1xf32>
    %c0_12 = arith.constant 0 : index
    %c0_13 = arith.constant 0 : index
    %28 = vector.load %arg15[%c0_12, %c0_13] : memref<8x1xf32, #tpu.memory_space<vmem>>, vector<8x1xf32>
    tpu.vector_store %arg15[%c0_12, %c0_13], %27 {strides = array<i32>} : memref<8x1xf32, #tpu.memory_space<vmem>>, vector<8x1xf32>,
    %c0_14 = arith.constant 0 : index
    %c0_15 = arith.constant 0 : index
    %29 = vector.load %arg16[%c0_14, %c0_15] : memref<8x128xf32, #tpu.memory_space<vmem>>, vector<8x128xf32>
    %30 = vector.broadcast %19 : vector<8x1xf32> to vector<8x128xf32>
    %31 = arith.mulf %30, %29 : vector<8x128xf32>
    %cst_16 = arith.constant dense<0.000000e+00> : vector<8x128xf32>
    %32 = tpu.matmul %22, %11, %cst_16 {dimension_numbers = #tpu.dot_dimension_numbers<[1], [0], [0], [1], [0, 0, 1, 1], [], []>} : vector<8x8xf32>, vector<8x128xf32>, vector<8x128xf32> -> vector<8x128xf32>
    %33 = arith.addf %31, %32 : vector<8x128xf32>
    %c0_17 = arith.constant 0 : index
    %c0_18 = arith.constant 0 : index
    %34 = vector.load %arg16[%c0_17, %c0_18] : memref<8x128xf32, #tpu.memory_space<vmem>>, vector<8x128xf32>
    tpu.vector_store %arg16[%c0_17, %c0_18], %33 {strides = array<i32>} : memref<8x128xf32, #tpu.memory_space<vmem>>, vector<8x128xf32>,
    %c0_19 = arith.constant 0 : index
    %c0_20 = arith.constant 0 : index
    %35 = vector.load %arg14[%c0_19, %c0_20] : memref<8x1xf32, #tpu.memory_space<vmem>>, vector<8x1xf32>
    tpu.vector_store %arg14[%c0_19, %c0_20], %17 {strides = array<i32>} : memref<8x1xf32, #tpu.memory_space<vmem>>, vector<8x1xf32>,
    %c0_i32_21 = arith.constant 0 : i32
    %36 = arith.cmpi eq, %arg2, %c0_i32_21 : i32
    %37 = arith.extui %36 : i1 to i32
    %c0_i32_22 = arith.constant 0 : i32
    %38 = arith.cmpi ne, %37, %c0_i32_22 : i32
    scf.if %38 {
      %c0_23 = arith.constant 0 : index
      %c0_24 = arith.constant 0 : index
      %39 = vector.load %arg16[%c0_23, %c0_24] : memref<8x128xf32, #tpu.memory_space<vmem>>, vector<8x128xf32>
      %c0_25 = arith.constant 0 : index
      %c0_26 = arith.constant 0 : index
      %40 = vector.load %arg15[%c0_25, %c0_26] : memref<8x1xf32, #tpu.memory_space<vmem>>, vector<8x1xf32>
      %41 = tpu.reciprocal %40 {approx = true} : vector<8x1xf32> -> vector<8x1xf32>
      %42 = vector.broadcast %41 : vector<8x1xf32> to vector<8x128xf32>
      %43 = arith.mulf %39, %42 : vector<8x128xf32>
      %c0_27 = arith.constant 0 : index
      %c0_28 = arith.constant 0 : index
      %44 = vector.load %arg7[%c0_27, %c0_28] : memref<128x128xf32, #tpu.memory_space<vmem>>, vector<128x128xf32>
      %cst_29 = arith.constant dense<0.000000e+00> : vector<8x128xf32>
      %45 = tpu.matmul %43, %44, %cst_29 {dimension_numbers = #tpu.dot_dimension_numbers<[1], [0], [0], [1], [0, 0, 1, 1], [], []>} : vector<8x128xf32>, vector<128x128xf32>, vector<8x128xf32> -> vector<8x128xf32>
      %c0_30 = arith.constant 0 : index
      %c0_31 = arith.constant 0 : index
      %c0_32 = arith.constant 0 : index
      %46 = vector.load %arg3[%c0_30, %c0_31, %c0_32] : memref<1x8x128xf32, #tpu.memory_space<vmem>>, vector<1x8x128xf32>
      %47 = vector.shape_cast %46 : vector<1x8x128xf32> to vector<8x128xf32>
      %48 = arith.addf %45, %47 : vector<8x128xf32>
      %cst_33 = arith.constant dense<0.000000e+00> : vector<8xf32>
      %49 = vector.multi_reduction <add>, %48, %cst_33 [1] : vector<8x128xf32> to vector<8xf32>
      %50 = vector.shape_cast %49 : vector<8xf32> to vector<8x1xf32>
      %cst_34 = arith.constant 1.280000e+02 : f32
      %51 = vector.broadcast %cst_34 : f32 to vector<8x1xf32>
      %52 = arith.divf %50, %51 : vector<8x1xf32>
      %53 = vector.broadcast %52 : vector<8x1xf32> to vector<8x128xf32>
      %54 = arith.subf %48, %53 : vector<8x128xf32>
      %55 = arith.mulf %54, %54 : vector<8x128xf32>
      %cst_35 = arith.constant dense<0.000000e+00> : vector<8xf32>
      %56 = vector.multi_reduction <add>, %55, %cst_35 [1] : vector<8x128xf32> to vector<8xf32>
      %57 = vector.shape_cast %56 : vector<8xf32> to vector<8x1xf32>
      %cst_36 = arith.constant 1.280000e+02 : f32
      %58 = vector.broadcast %cst_36 : f32 to vector<8x1xf32>
      %59 = arith.divf %57, %58 : vector<8x1xf32>
      %60 = vector.broadcast %52 : vector<8x1xf32> to vector<8x128xf32>
      %61 = arith.subf %48, %60 : vector<8x128xf32>
      %cst_37 = arith.constant 9.99999974E-6 : f32
      %62 = vector.broadcast %cst_37 : f32 to vector<8x1xf32>
      %63 = arith.addf %59, %62 : vector<8x1xf32>
      %64 = math.rsqrt %63 : vector<8x1xf32>
      %65 = vector.broadcast %64 : vector<8x1xf32> to vector<8x128xf32>
      %66 = arith.mulf %61, %65 : vector<8x128xf32>
      %c0_38 = arith.constant 0 : index
      %c0_39 = arith.constant 0 : index
      %67 = vector.load %arg8[%c0_38, %c0_39] : memref<1x128xf32, #tpu.memory_space<vmem>>, vector<1x128xf32>
      %68 = vector.broadcast %67 : vector<1x128xf32> to vector<8x128xf32>
      %69 = arith.mulf %66, %68 : vector<8x128xf32>
      %c0_40 = arith.constant 0 : index
      %c0_41 = arith.constant 0 : index
      %70 = vector.load %arg9[%c0_40, %c0_41] : memref<1x128xf32, #tpu.memory_space<vmem>>, vector<1x128xf32>
      %71 = vector.broadcast %70 : vector<1x128xf32> to vector<8x128xf32>
      %72 = arith.addf %69, %71 : vector<8x128xf32>
      %c0_42 = arith.constant 0 : index
      %c0_43 = arith.constant 0 : index
      %c0_44 = arith.constant 0 : index
      %73 = vector.load %arg10[%c0_42, %c0_43, %c0_44] : memref<1x8x128xf32, #tpu.memory_space<vmem>>, vector<1x8x128xf32>
      %74 = vector.shape_cast %73 : vector<1x8x128xf32> to vector<8x128xf32>
      %75 = vector.shape_cast %72 : vector<8x128xf32> to vector<1x8x128xf32>
      tpu.vector_store %arg10[%c0_42, %c0_43, %c0_44], %75 {strides = array<i32>} : memref<1x8x128xf32, #tpu.memory_space<vmem>>, vector<1x8x128xf32>,
    } else {
    }
    return
  }
  func.func @transform_0(%arg0: i32, %arg1: i32, %arg2: i32) -> (i32, i32, i32) {
    %c0_i32 = arith.constant 0 : i32
    %c0_i32_0 = arith.constant 0 : i32
    return %arg0, %arg1, %c0_i32 : i32, i32, i32
  }
  func.func @transform_1(%arg0: i32, %arg1: i32, %arg2: i32) -> (i32, i32, i32) {
    %c0_i32 = arith.constant 0 : i32
    %c0_i32_0 = arith.constant 0 : i32
    return %arg0, %arg2, %c0_i32 : i32, i32, i32
  }
  func.func @transform_2(%arg0: i32, %arg1: i32, %arg2: i32) -> (i32, i32) {
    %c0_i32 = arith.constant 0 : i32
    %c0_i32_0 = arith.constant 0 : i32
    %c0_i32_1 = arith.constant 0 : i32
    return %c0_i32, %c0_i32_0 : i32, i32
  }
  func.func @transform_3(%arg0: i32, %arg1: i32, %arg2: i32) -> (i32, i32) {
    %c0_i32 = arith.constant 0 : i32
    %c0_i32_0 = arith.constant 0 : i32
    %c0_i32_1 = arith.constant 0 : i32
    return %c0_i32, %c0_i32_0 : i32, i32
  }
  func.func @transform_4(%arg0: i32, %arg1: i32, %arg2: i32) -> (i32, i32) {
    %c0_i32 = arith.constant 0 : i32
    %c0_i32_0 = arith.constant 0 : i32
    %c0_i32_1 = arith.constant 0 : i32
    return %c0_i32, %c0_i32_0 : i32, i32
  }
  func.func @transform_5(%arg0: i32, %arg1: i32, %arg2: i32) -> (i32, i32) {
    %c0_i32 = arith.constant 0 : i32
    %c0_i32_0 = arith.constant 0 : i32
    %c0_i32_1 = arith.constant 0 : i32
    return %c0_i32, %c0_i32_0 : i32, i32
  }
  func.func @transform_6(%arg0: i32, %arg1: i32, %arg2: i32) -> (i32, i32) {
    %c0_i32 = arith.constant 0 : i32
    %c0_i32_0 = arith.constant 0 : i32
    %c0_i32_1 = arith.constant 0 : i32
    return %c0_i32, %c0_i32_0 : i32, i32
  }
  func.func @transform_7(%arg0: i32, %arg1: i32, %arg2: i32) -> (i32, i32, i32) {
    %c0_i32 = arith.constant 0 : i32
    %c0_i32_0 = arith.constant 0 : i32
    return %arg0, %arg1, %c0_i32 : i32, i32, i32
  }
}

</mosaic_0001>

<bundles_post_ra>
// kernel: tpu_custom_call.1
= control target key start
LH: loop header
LB: loop body
LE: loop exit
PB: predicated region body
PF: predicated region fallthrough
CT: control target
= control target key end

     0   :  { %s2084_s0 = inlined_call_operand.hbm [shape: f32[2,8,128], index: 0, kind: input, shape index: {}]   ;;  %s2085_s1 = inlined_call_operand.hbm [shape: f32[2,8,128], index: 1, kind: input, shape index: {}]   ;;  %s2086_s2 = inlined_call_operand.hbm [shape: f32[128,128], index: 2, kind: input, shape index: {}]   ;;  %s2087_s3 = inlined_call_operand.hbm [shape: f32[128,256], index: 3, kind: input, shape index: {}]   ;;  %s2088_s4 = inlined_call_operand.hbm [shape: f32[128,128], index: 4, kind: input, shape index: {}]   ;;  %s2089_s5 = inlined_call_operand.vmem [shape: f32[1,128], index: 5, kind: input, shape index: {}]   ;;  %s2090_s6 = inlined_call_operand.vmem [shape: f32[1,128], index: 6, kind: input, shape index: {}]   ;;  %s2091_s7 = inlined_call_operand.hbm [shape: f32[2,8,128], index: 7, kind: output, shape index: {}]  }
   0x1   :  { %2101 = sst [smem:[#allocation26_spill]] %s2086_s2 }
   0x2   :  { %2102 = sst [smem:[#allocation27_spill]] %s2087_s3 }
   0x3   :  { %2103 = sst [smem:[#allocation28_spill]] %s2088_s4 }
   0x4   :  { %12 = vsyncpa [#allocation9], 0 }
   0x5   :  { %14 = vsyncpa [#allocation9 + $0x1], 0 }
   0x6   :  { %15 = vsyncpa [#allocation12], 0 }
   0x7   :  { %17 = vsyncpa [#allocation12 + $0x1], 0 }
   0x8   :  { %18 = vsyncpa [#allocation15], 0 }
   0x9   :  { %19 = vsyncpa [#allocation10], 0 }
   0xa   :  { %21 = vsyncpa [#allocation10 + $0x1], 0  ;;  %s1716_s24 = smov 0   ;;  %s1718_s25 = smov 0  }
   0xb   :  { %s1720_s26 = smov 0   ;;  %s1722_s27 = smov 0  }
   0xc   :  { %s1724_s28 = smov 0   ;;  %s1726_s29 = smov 0  }
   0xd LB: > { %2104 = sst [smem:[#allocation23_spill]] %s1639_s24  ;;  %s1747_s30 = sadd.s32 4294967295, %s1659_s29   ;;  %s1659_s29 = sphi %s1726_s29, %s27_s29   ;;  %s1655_s28 = sphi %s1724_s28, %s2137_s28   ;;  %s1651_s27 = sphi %s1722_s27, %s2136_s27   ;;  %s1647_s26 = sphi %s1720_s26, %s2135_s26   ;;  %s1643_s25 = sphi %s1718_s25, %s2134_s25   ;;  %s1639_s24 = sphi %s1716_s24, %s2133_s24  }
   0xe   : > { %s1082_s8 = sadd.s32 4294967294, %s1659_s29   ;;  %p68_p0 = scmp.ne.s32.totalorder %s1643_s25, %s1639_s24 }
   0xf   : > { %p2092_p1 = scmp.eq.s32.totalorder %s1747_s30, 0  ;;  %p233_p3 = scmp.eq.s32.totalorder %s1082_s8, 1 }
  0x10   : > { %p1083_p5 = scmp.ge.s32.totalorder %s1659_s29, 1  ;;  %p240_p7 = scmp.lt.s32.totalorder %s1659_s29, 3 }
  0x11   : > { %p1756_p4 = por %p2092_p1, %p68_p0  ;;  %p1761_p6 = por %p233_p3, %p68_p0 }
  0x12   : > { %p1766_p8 = pnand %p1083_p5, %p240_p7  ;;  %s1661_s12 = smov [#allocation13]  }
  0x13   : > { %s2105_s9 = scalar_select %p1756_p4, 1, 0 }
  0x14   : > { %s2106_s10 = scalar_select %p1761_p6, 1, 0 }
  0x15   : > { %s2108_s11 = scalar_select %p1766_p8, 1, 0 }
  0x16   : > { %2107 = sst [smem:[#allocation24_spill]] %s2106_s10  ;;  %s252_s13 = sshll.u32 %s1661_s12, 4  ;;  %s1770_s13 = int_to_ptr.vmem [resolvable:$true] %s252_s13 }
  0x17   : > { %p1322_p9 = pneg %p1766_p8  ;;  %s1662_s15 = smov [#allocation14]  }
  0x18   : > { %s265_s16 = sshll.u32 %s1662_s15, 4  ;;  %s2110_s2 = sld [smem:[#allocation26_spill]]  ;;  %s1781_s16 = int_to_ptr.vmem [resolvable:$true] %s265_s16 }
  0x19   : > { %p1777_p11 = pnand %p1322_p9, %p2092_p1 }
  0x1b   : > { %p1791_p13 = pneg %p1777_p11 }
  0x1e   : > { %s1421_s19 = scalar_lea.hbm %s2110_s2, 2048 }
  0x1f   : > { %p1422_p12 = scmp.ne.s32.totalorder %s2110_s2, %s1421_s19  ;;  %p1428_p5 = scmp.lt.u32.totalorder %s1421_s19, %s2110_s2 }
  0x21   : > { %p1424_p0 = pnand %p1791_p13, %p1422_p12 }
  0x23   : > { %p1425_p3 = pneg %p1424_p0 }
  0x25   : > { %p1430_p7 = pnand %p1428_p5, %p1425_p3 }
  0x27   : > { %1433 = shalt.err (!%p1430_p7)
}
  0x28   : > { %s1434_s12 = scalar_lea.vmem %s1770_s13, 2048  ;;  %p1442_p2 = scmp.lt.s32.totalorder %s1770_s13, %s1770_s13 }
  0x29   : > { %p1435_p9 = scmp.ne.s32.totalorder %s1770_s13, %s1434_s12  ;;  %p1443_p6 = scmp.lt.s32.totalorder %s1434_s12, %s1434_s12 }
  0x2b   : > { %p1437_p10 = pnand %p1435_p9, %p1791_p13  ;;  %p1444_p12 = por %p1443_p6, %p1442_p2 }
  0x2d   : > { %p1438_p1 = pneg %p1437_p10 }
  0x2f   : > { %p1445_p0 = pnand %p1444_p12, %p1438_p1 }
  0x31   : > { %1448 = shalt.err (!%p1445_p0)
}
  0x32   : > { %s2095_s15 = smov 128   ;;  %s2096_s17 = smov 8  }
  0x33   : > { %1325 = dma.hbm_to_vmem [thread:$0]  (!%p1777_p11), %s2110_s2, 2048, %s1770_s13, [#allocation12], %s2095_s15, %s2095_s15, %s2096_s17  }
  0x34   : > { %s2112_s3 = sld [smem:[#allocation27_spill]] }
  0x3a   : > { %s1449_s23 = scalar_lea.hbm %s2112_s3, 4096 }
  0x3b   : > { %p1450_p1 = scmp.ne.s32.totalorder %s2112_s3, %s1449_s23  ;;  %p1456_p10 = scmp.lt.u32.totalorder %s1449_s23, %s2112_s3 }
  0x3d   : > { %p1452_p2 = pnand %p1450_p1, %p1791_p13 }
  0x3f   : > { %p1453_p6 = pneg %p1452_p2 }
  0x41   : > { %p1458_p3 = pnand %p1456_p10, %p1453_p6 }
  0x43   : > { %1461 = shalt.err (!%p1458_p3)
}
  0x44   : > { %s1462_s13 = scalar_lea.vmem %s1781_s16, 4096  ;;  %p1470_p12 = scmp.lt.s32.totalorder %s1781_s16, %s1781_s16 }
  0x45   : > { %p1463_p5 = scmp.ne.s32.totalorder %s1781_s16, %s1462_s13  ;;  %p1471_p0 = scmp.lt.s32.totalorder %s1462_s13, %s1462_s13 }
  0x47   : > { %p1465_p7 = pnand %p1463_p5, %p1791_p13  ;;  %p1472_p1 = por %p1471_p0, %p1470_p12 }
  0x49   : > { %p1466_p9 = pneg %p1465_p7 }
  0x4b   : > { %p1473_p2 = pnand %p1472_p1, %p1466_p9 }
  0x4d   : > { %1476 = shalt.err (!%p1473_p2)
}
  0x4e   : > { %s1665_s18 = smov 256   ;;  %s1666_s24 = smov 16  }
  0x4f   : > { %1328 = dma.hbm_to_vmem [thread:$0]  (!%p1777_p11), %s2112_s3, 4096, %s1781_s16, [#allocation15], %s1665_s18, %s1665_s18, %s1666_s24  }
  0x50   : > { %s1667_s20 = smov [#allocation16]   ;;  %s2113_s4 = sld [smem:[#allocation28_spill]] }
  0x51   : > { %s278_s21 = sshll.u32 %s1667_s20, 4  ;;  %s279_s21 = int_to_ptr.vmem [resolvable:$true] %s278_s21 }
  0x56   : > { %s1477_s12 = scalar_lea.hbm %s2113_s4, 2048 }
  0x57   : > { %p1478_p6 = scmp.ne.s32.totalorder %s2113_s4, %s1477_s12  ;;  %p1484_p5 = scmp.lt.u32.totalorder %s1477_s12, %s2113_s4 }
  0x59   : > { %p1480_p10 = pnand %p1478_p6, %p1791_p13 }
  0x5b   : > { %p1481_p3 = pneg %p1480_p10 }
  0x5d   : > { %p1486_p7 = pnand %p1484_p5, %p1481_p3 }
  0x5f   : > { %1489 = shalt.err (!%p1486_p7)
}
  0x60   : > { %s1490_s16 = scalar_lea.vmem %s279_s21, 2048  ;;  %p1498_p1 = scmp.lt.s32.totalorder %s279_s21, %s279_s21 }
  0x61   : > { %p1491_p9 = scmp.ne.s32.totalorder %s279_s21, %s1490_s16  ;;  %p1499_p2 = scmp.lt.s32.totalorder %s1490_s16, %s1490_s16 }
  0x63   : > { %p1493_p12 = pnand %p1491_p9, %p1791_p13  ;;  %p1500_p4 = por %p1499_p2, %p1498_p1 }
  0x65   : > { %p1494_p0 = pneg %p1493_p12 }
  0x67   : > { %p1501_p8 = pnand %p1500_p4, %p1494_p0 }
  0x69   : > { %1504 = shalt.err (!%p1501_p8)
}
  0x6a   : > { %s2114_s15 = smov 8   ;;  %s2115_s18 = smov 128  }
  0x6b   : > { %1331 = dma.hbm_to_vmem [thread:$0]  (!%p1777_p11), %s2113_s4, 2048, %s279_s21, [#allocation15], %s2115_s18, %s2115_s18, %s2114_s15  }
  0x6c   : > { %s46_s22 = sadd.s32 1, %s1655_s28  ;;  %s55_s14 = sadd.s32 1, %s1647_s26 }
  0x6d   : > { %p48_p4 = scmp.ge.s32.totalorder %s46_s22, 2  ;;  %p62_p8 = scmp.ne.s32.totalorder %s1647_s26, %s1643_s25 }
  0x6e   : > { %p63_p13 = scmp.eq.s32.totalorder %s1659_s29, 0  ;;  %p2118_p10 = scmp.eq.s32.totalorder %s1747_s30, 1 }
  0x6f   : > { %s2139_s22 = smov (%p48_p4, %s46_s22), 0  ;;  %p1346_p11 = scmp.lt.s32.totalorder %s1659_s29, 2 }
  0x70   : > { %2116 = sst [smem:[#allocation25_spill]] %s2139_s22  ;;  %p1866_p6 = por %p63_p13, %p62_p8 }
  0x71   : > { %p1872_p3 = por %p2118_p10, %p62_p8  ;;  %s50_s19 = ssub.s32 %s1655_s28, %s2139_s22 }
  0x72   : > { %p53_p5 = scmp.eq.s32.totalorder %s50_s19, 0  ;;  %s298_s20 = sand.u32 1, %s1647_s26  }
  0x73   : > { %s2119_s10 = scalar_select %p1872_p3, 1, 0 }
  0x74   : > { %s1880_s21 = sshll.u32 %s298_s20, 3  ;;  %s1089_s8 = sshll.u32 %s1655_s28, 7 }
  0x75   : > { %s1883_s23 = scalar_select %p53_p5, %s1647_s26, %s55_s14  }
  0x76   : > { %s1889_s16 = scalar_lea.hbm %s2084_s0, %s1089_s8  ;;  %s302_s15 = scalar_lea.vmem [#allocation8], %s1880_s21 }
  0x77   : > { %s310_s18 = sshll.u32 %s302_s15, 4  ;;  %p1896_p7 = pnand %p1346_p11, %p1866_p6  ;;  %s1892_s18 = int_to_ptr.vmem [resolvable:$true] %s310_s18 }
  0x78   : > { %s1903_s19 = scalar_lea.hbm %s2085_s1, %s1089_s8  ;;  %s317_s12 = sand.u32 1, %s1659_s29  }
  0x79   : > { %s299_s13 = scalar_lea.sflag [#allocation9], %s298_s20  ;;  %s1505_s3 = scalar_lea.hbm %s1889_s16, 128 }
  0x7a   : > { %p1506_p9 = scmp.ne.s32.totalorder %s1889_s16, %s1505_s3  ;;  %p1507_p12 = pneg %p1896_p7 }
  0x7b   : > { %s1510_s4 = scalar_lea.hbm %s2084_s0, 256  ;;  %p1511_p2 = scmp.lt.u32.totalorder %s1889_s16, %s2084_s0 }
  0x7c   : > { %p1508_p0 = pnand %p1507_p12, %p1506_p9  ;;  %p1512_p4 = scmp.lt.u32.totalorder %s1510_s4, %s1505_s3 }
  0x7d   : > { %p1514_p13 = scmp.lt.u32.totalorder %s1505_s3, %s1889_s16 }
  0x7e   : > { %p1509_p1 = pneg %p1508_p0  ;;  %p1513_p8 = por %p1512_p4, %p1511_p2 }
  0x80   : > { %p1515_p6 = por %p1514_p13, %p1513_p8 }
  0x82   : > { %p1516_p10 = pnand %p1515_p6, %p1509_p1 }
  0x84   : > { %1519 = shalt.err (!%p1516_p10)
}
  0x85   : > { %s1520_s20 = scalar_lea.vmem %s1892_s18, 128  ;;  %s1668_s8 = smov [#allocation8]  }
  0x86   : > { %p1521_p11 = scmp.ne.s32.totalorder %s1892_s18, %s1520_s20  ;;  %s1525_s14 = sshll.u32 %s1668_s8, 4  ;;  %s1526_s14 = int_to_ptr.vmem [resolvable:$false] %s1525_s14 }
  0x87   : > { %s1527_s22 = scalar_lea.vmem %s1526_s14, 256  ;;  %p1528_p0 = scmp.lt.s32.totalorder %s1892_s18, %s1526_s14 }
  0x88   : > { %p1523_p5 = pnand %p1521_p11, %p1507_p12  ;;  %p1529_p2 = scmp.lt.s32.totalorder %s1527_s22, %s1520_s20 }
  0x8a   : > { %p1524_p9 = pneg %p1523_p5  ;;  %p1530_p4 = por %p1529_p2, %p1528_p0 }
  0x8c   : > { %p1531_p8 = pnand %p1530_p4, %p1524_p9 }
  0x8e   : > { %1534 = shalt.err (!%p1531_p8)
}
  0x8f   : > { %1335 = dma.hbm_to_vmem [thread:$0]  (!%p1896_p7), %s1889_s16, 128, %s1892_s18, %s299_s13  }
  0x90   : > { %s321_s3 = scalar_lea.vmem [#allocation11], %s1880_s21  ;;  %s318_s24 = scalar_lea.sflag [#allocation12], %s317_s12 }
  0x91   : > { %s329_s4 = sshll.u32 %s321_s3, 4  ;;  %s1535_s15 = scalar_lea.hbm %s1903_s19, 128  ;;  %s330_s4 = int_to_ptr.vmem [resolvable:$true] %s329_s4 }
  0x92   : > { %p1536_p1 = scmp.ne.s32.totalorder %s1903_s19, %s1535_s15  ;;  %s1540_s8 = scalar_lea.hbm %s2085_s1, 256 }
  0x93   : > { %p1541_p10 = scmp.lt.u32.totalorder %s1903_s19, %s2085_s1  ;;  %p1542_p11 = scmp.lt.u32.totalorder %s1540_s8, %s1535_s15 }
  0x94   : > { %p1538_p13 = pnand %p1536_p1, %p1507_p12  ;;  %p1544_p9 = scmp.lt.u32.totalorder %s1535_s15, %s1903_s19 }
  0x95   : > { %p1543_p5 = por %p1542_p11, %p1541_p10 }
  0x96   : > { %p1539_p6 = pneg %p1538_p13 }
  0x97   : > { %p1545_p0 = por %p1544_p9, %p1543_p5 }
  0x99   : > { %p1546_p2 = pnand %p1545_p0, %p1539_p6 }
  0x9b   : > { %1549 = shalt.err (!%p1546_p2)
}
  0x9c   : > { %s1550_s21 = scalar_lea.vmem %s330_s4, 128  ;;  %s1669_s16 = smov [#allocation11]  }
  0x9d   : > { %p1551_p4 = scmp.ne.s32.totalorder %s330_s4, %s1550_s21  ;;  %s1555_s18 = sshll.u32 %s1669_s16, 4  ;;  %s1556_s18 = int_to_ptr.vmem [resolvable:$false] %s1555_s18 }
  0x9e   : > { %s1557_s12 = scalar_lea.vmem %s1556_s18, 256  ;;  %p1558_p13 = scmp.lt.s32.totalorder %s330_s4, %s1556_s18 }
  0x9f   : > { %p1553_p8 = pnand %p1551_p4, %p1507_p12  ;;  %p1559_p3 = scmp.lt.s32.totalorder %s1557_s12, %s1550_s21 }
  0xa1   : > { %p1554_p1 = pneg %p1553_p8  ;;  %p1560_p10 = por %p1559_p3, %p1558_p13 }
  0xa3   : > { %p1561_p11 = pnand %p1560_p10, %p1554_p1 }
  0xa5   : > { %1564 = shalt.err (!%p1561_p11)
}
  0xa6   : > { %1338 = dma.hbm_to_vmem [thread:$0]  (!%p1896_p7), %s1903_s19, 128, %s330_s4, %s318_s24  }
  0xa7   : > { %p2121_p6 = scmp.ne.s32.totalorder %s2108_s11, 0 }
  0xa8   : > { %s1956_s13 = sand.u32 (!%p2121_p6), 1, %s1643_s25   ;;  %p2122_p3 = scmp.ne.s32.totalorder (!%p2121_p6), %s2105_s9, 0 }
  0xa9   : > { %338 = sbr.rel (%p2121_p6) target bundleno = 1769 (0x6e9), region = 48  ;;  %s1959_s3 = sshll.u32 (!%p2121_p6), %s1956_s13, 3 }
  0xaa   : > { %s341_s15 = scalar_lea.sflag (!%p2121_p6), [#allocation9], %s1956_s13  ;;  %s344_s17 = scalar_lea.vmem (!%p2121_p6), [#allocation8], %s1959_s3 }
  0xb0   : > { %1618 = dma.done.wait (%p2122_p3), %s341_s15, 128  }
  0xb1   : > { %1620 = vsyncadd (%p2122_p3), %s341_s15, 4294967168  ;;  %s349_s11 = sand.u32 1, %s1747_s30   ;;  %s353_s19 = scalar_lea.vmem [#allocation11], %s1959_s3 }
  0xb2   : > { %s350_s2 = scalar_lea.sflag [#allocation12], %s349_s11 }
  0xb3   : > { %1622 = dma.done.wait (%p2122_p3), %s350_s2, 128  }
  0xb4   : > { %1624 = vsyncadd (%p2122_p3), %s350_s2, 4294967168  ;;  %p2123_p7 = scmp.eq.s32.totalorder %s1747_s30, 0 }
  0xb6   : > { %1626 = dma.done.wait (%p2123_p7), [#allocation12], 2048   ;;  %p2124_p12 = pmov %p2123_p7 }
  0xb7   : > { %p2125_p5 = pmov %p2123_p7 }
  0xb8   : > { %1628 = vsyncadd (%p2124_p12), [#allocation12], 4294965248 }
  0xb9   : > { %1630 = dma.done.wait (%p2125_p5), [#allocation15], 6144   ;;  %p2126_p9 = pmov %p2125_p5 }
  0xba   : > { %v1670_v0 = vmov 0.0|0.0   ;;  %v1671_v1 = vmov 0.0   ;;  %vm1672_vm0 = vmmov 0   ;;  %v504_v2 = vld [vmem:[#allocation14 + $0x8] sm:$0xff]  ;;  %v506_v3 = vld [vmem:[#allocation14 + $0x18] sm:$0xff]  ;;  %v503_v4 = vld [vmem:[#allocation14] sm:$0xff] }
  0xbb   : > { %1632 = vsyncadd (%p2126_p9), [#allocation15], 4294961152  ;;  %1224 = vmatprep.subr.bf16.mxu0 %v1670_v0  ;;  %599 = vmatprep.mubr.f32.mxu1 %v1671_v1  ;;  %v1248_v5 = vpack.c.bf16 %v506_v3, %v504_v2  ;;  %v505_v6 = vld [vmem:[#allocation14 + $0x10] sm:$0xff]  ;;  %v406_v7 = vld [vmem:[#allocation13] sm:$0xff]  ;;  %vm494_vm1 = vcmask 7168   ;;  %vm688_vm2 = vcmask 64512  }
  0xbc   : > { %1176 = vmatprep.mubr.msk.f32.mxu0 %vm1672_vm0, %v1671_v1  ;;  %v407_v8 = vld [vmem:[#allocation13 + $0x8] sm:$0xff]  ;;  %v1250_v9 = vpack.c.bf16 %v505_v6, %v503_v4  ;;  %v510_v12 = vld [vmem:[#allocation14 + $0x38] sm:$0xff]  ;;  %v507_v13 = vld [vmem:[#allocation14 + $0x20] sm:$0xff]  ;;  %496 = vst.msk [vmem:[#allocation6] sm:$0xff] %vm494_vm1, %v1671_v1  ;;  %s1103_s20 = sshll.u32 %s1651_s27, 7  ;;  %s400_s8 = scalar_lea.vmem [#allocation17], %s1959_s3 }
  0xbd   : > { %v1225_v10 = vpack.c.bf16 %v407_v8, %v406_v7  ;;  %v508_v11 = vld [vmem:[#allocation14 + $0x28] sm:$0xff]  ;;  %1249 = vmatprep.subr.bf16.mxu1 %v1248_v5  ;;  %v509_v15 = vld [vmem:[#allocation14 + $0x30] sm:$0xff]  ;;  %v409_v17 = vld [vmem:[#allocation13 + $0x18] sm:$0xff]  ;;  %s938_s14 = sshll.u32 %s400_s8, 4  ;;  %s2035_s16 = scalar_lea.hbm %s2091_s7, %s1103_s20  ;;  %s2037_s14 = int_to_ptr.vmem [resolvable:$true] %s938_s14 }
  0xbe   : > { %v1252_v14 = vpack.c.bf16 %v510_v12, %v508_v11  ;;  %v408_v16 = vld [vmem:[#allocation13 + $0x10] sm:$0xff]  ;;  %1251 = vmatpush1.bf16.msra.mxu1 %v1250_v9  ;;  %v1254_v18 = vpack.c.bf16 %v509_v15, %v507_v13  ;;  %v512_v20 = vld [vmem:[#allocation14 + $0x48] sm:$0xff]  ;;  %v514_v21 = vld [vmem:[#allocation14 + $0x58] sm:$0xff]  ;;  %s924_s18 = scalar_lea.sflag [#allocation10], %s1956_s13  ;;  %s1565_s12 = scalar_lea.vmem %s2037_s14, 128 }
  0xbf   : > { %1226 = vmatpush3.bf16.msra.mxu0 %v1225_v10  ;;  %v1228_v19 = vpack.c.bf16 %v409_v17, %v408_v16  ;;  %v511_v22 = vld [vmem:[#allocation14 + $0x40] sm:$0xff]  ;;  %v1256_v23 = vpack.c.bf16 %v514_v21, %v512_v20  ;;  %v513_v24 = vld [vmem:[#allocation14 + $0x50] sm:$0xff]  ;;  %v411_v26 = vld [vmem:[#allocation13 + $0x28] sm:$0xff]  ;;  %p1566_p0 = scmp.ne.s32.totalorder %s2037_s14, %s1565_s12  ;;  %p2127_p2 = scmp.ne.s32.totalorder %s2119_s10, 0 }
  0xc0   : > { %1253 = vmatprep.subr.bf16.mxu1 %v1252_v14  ;;  %1227 = vmatprep.subr.bf16.mxu0 %v1670_v0  ;;  %v410_v25 = vld [vmem:[#allocation13 + $0x20] sm:$0xff]  ;;  %v516_v27 = vld [vmem:[#allocation14 + $0x68] sm:$0xff]  ;;  %v518_v28 = vld [vmem:[#allocation14 + $0x78] sm:$0xff]  ;;  %v1258_v29 = vpack.c.bf16 %v513_v24, %v511_v22  ;;  %s1675_s27 = smov [#allocation17]  }
  0xc1   : > { %v1231_v30 = vpack.c.bf16 %v411_v26, %v410_v25  ;;  %v515_v31 = vld [vmem:[#allocation14 + $0x60] sm:$0xff]  ;;  %v1260_v32 = vpack.c.bf16 %v518_v28, %v516_v27  ;;  %v517_v33 = vld [vmem:[#allocation14 + $0x70] sm:$0xff]  ;;  %v413_v35 = vld [vmem:[#allocation13 + $0x38] sm:$0xff]  ;;  %p1567_p4 = pnand %p1566_p0, %p2127_p2  ;;  %s1569_s3 = sshll.u32 %s1675_s27, 4  ;;  %s1570_s3 = int_to_ptr.vmem [resolvable:$false] %s1569_s3 }
  0xc2   : > { %1255 = vmatpush1.bf16.msra.mxu1 %v1254_v18  ;;  %v412_v34 = vld [vmem:[#allocation13 + $0x30] sm:$0xff]  ;;  %v520_v36 = vld [vmem:[#allocation14 + $0x88] sm:$0xff]  ;;  %v522_v37 = vld [vmem:[#allocation14 + $0x98] sm:$0xff]  ;;  %v1262_v38 = vpack.c.bf16 %v517_v33, %v515_v31  ;;  %s1571_s15 = scalar_lea.vmem %s1570_s3, 256  ;;  %p1572_p1 = scmp.lt.s32.totalorder %s2037_s14, %s1570_s3 }
  0xc3   : > { %1229 = vmatpush3.bf16.msra.mxu0 %v1228_v19  ;;  %1257 = vmatprep.subr.bf16.mxu1 %v1256_v23  ;;  %v1234_v39 = vpack.c.bf16 %v413_v35, %v412_v34  ;;  %v519_v40 = vld [vmem:[#allocation14 + $0x80] sm:$0xff]  ;;  %v1264_v41 = vpack.c.bf16 %v522_v37, %v520_v36  ;;  %v521_v42 = vld [vmem:[#allocation14 + $0x90] sm:$0xff]  ;;  %v415_v44 = vld [vmem:[#allocation13 + $0x48] sm:$0xff]  ;;  %v1673_v19 = vmov -inf   ;;  %v1674_v23 = vmov 0   ;;  %p1568_p8 = pneg %p1567_p4  ;;  %p1573_p13 = scmp.lt.s32.totalorder %s1571_s15, %s1565_s12 }
  0xc4   : > { %1230 = vmatprep.subr.bf16.mxu0 %v1670_v0  ;;  %v414_v43 = vld [vmem:[#allocation13 + $0x40] sm:$0xff]  ;;  %v524_v45 = vld [vmem:[#allocation14 + $0xa8] sm:$0xff]  ;;  %v526_v46 = vld [vmem:[#allocation14 + $0xb8] sm:$0xff]  ;;  %v1266_v47 = vpack.c.bf16 %v521_v42, %v519_v40  ;;  %495 = vst.msk [vmem:[#allocation5] sm:$0xff] %vm494_vm1, %v1673_v19  ;;  %1411 = vset.pattern.permute.xlu0 %v1674_v23 }
  0xc5   : > { %v1237_v48 = vpack.c.bf16 %v415_v44, %v414_v43  ;;  %v523_v49 = vld [vmem:[#allocation14 + $0xa0] sm:$0xff]  ;;  %v1268_v50 = vpack.c.bf16 %v526_v46, %v524_v45  ;;  %v525_v51 = vld [vmem:[#allocation14 + $0xb0] sm:$0xff]  ;;  %v417_v53 = vld [vmem:[#allocation13 + $0x58] sm:$0xff]  ;;  %1412 = vset.pattern.permute.xlu1 %v1674_v23  ;;  %p1574_p10 = por %p1573_p13, %p1572_p1 }
  0xc6   : > { %1259 = vmatpush1.bf16.msra.mxu1 %v1258_v29  ;;  %v416_v52 = vld [vmem:[#allocation13 + $0x50] sm:$0xff]  ;;  %v528_v54 = vld [vmem:[#allocation14 + $0xc8] sm:$0xff]  ;;  %v530_v55 = vld [vmem:[#allocation14 + $0xd8] sm:$0xff]  ;;  %v1270_v56 = vpack.c.bf16 %v525_v51, %v523_v49 }
  0xc7   : > { %1232 = vmatpush3.bf16.msra.mxu0 %v1231_v30  ;;  %1261 = vmatprep.subr.bf16.mxu1 %v1260_v32  ;;  %v1240_v57 = vpack.c.bf16 %v417_v53, %v416_v52  ;;  %v527_v58 = vld [vmem:[#allocation14 + $0xc0] sm:$0xff]  ;;  %v1272_v59 = vpack.c.bf16 %v530_v55, %v528_v54  ;;  %v529_v60 = vld [vmem:[#allocation14 + $0xd0] sm:$0xff]  ;;  %v419_v62 = vld [vmem:[#allocation13 + $0x68] sm:$0xff]  ;;  %p1575_p11 = pnand %p1574_p10, %p1568_p8 }
  0xc8   : > { %1233 = vmatprep.subr.bf16.mxu0 %v1670_v0  ;;  %v418_v61 = vld [vmem:[#allocation13 + $0x60] sm:$0xff]  ;;  %v532_v63 = vld [vmem:[#allocation14 + $0xe8] sm:$0xff]  ;;  %v534_v2 = vld [vmem:[#allocation14 + $0xf8] sm:$0xff]  ;;  %v1274_v3 = vpack.c.bf16 %v529_v60, %v527_v58 }
  0xc9   : > { %v1243_v4 = vpack.c.bf16 %v419_v62, %v418_v61  ;;  %v531_v5 = vld [vmem:[#allocation14 + $0xe0] sm:$0xff]  ;;  %v1276_v6 = vpack.c.bf16 %v534_v2, %v532_v63  ;;  %v533_v7 = vld [vmem:[#allocation14 + $0xf0] sm:$0xff]  ;;  %v421_v9 = vld [vmem:[#allocation13 + $0x78] sm:$0xff] }
  0xca   : > { %1263 = vmatpush1.bf16.msra.mxu1 %v1262_v38  ;;  %v420_v8 = vld [vmem:[#allocation13 + $0x70] sm:$0xff]  ;;  %v1278_v10 = vpack.c.bf16 %v533_v7, %v531_v5  ;;  %v1996_v13 = vld [vmem:[%s344_s17] sm:$0xff]  ;;  %v810_v38 = vld [vmem:[#allocation16 + $0x18] sm:$0xff] }
  0xcb   : > { %1235 = vmatpush3.bf16.msra.mxu0 %v1234_v39  ;;  %1265 = vmatprep.subr.bf16.mxu1 %v1264_v41  ;;  %v1246_v11 = vpack.c.bf16 %v421_v9, %v420_v8  ;;  %v502_v12 = vld [vmem:[%s353_s19] sm:$0xff]  ;;  %v807_v34 = vld [vmem:[#allocation16] sm:$0xff]  ;;  %v808_v35 = vld [vmem:[#allocation16 + $0x8] sm:$0xff] }
  0xcc   : > { %1236 = vmatprep.subr.bf16.mxu0 %v1670_v0  ;;  %v687_v24 = vld [vmem:[#allocation5] sm:$0xff]  ;;  %v1281_v37 = vpack.c.bf16 %v808_v35, %v807_v34  ;;  %v811_v40 = vld [vmem:[#allocation16 + $0x20] sm:$0xff]  ;;  %v812_v41 = vld [vmem:[#allocation16 + $0x28] sm:$0xff] }
  0xcd   : > { %v809_v36 = vld [vmem:[#allocation16 + $0x10] sm:$0xff]  ;;  %v1287_v42 = vpack.c.bf16 %v812_v41, %v811_v40  ;;  %v814_v44 = vld [vmem:[#allocation16 + $0x38] sm:$0xff]  ;;  %v815_v46 = vld [vmem:[#allocation16 + $0x40] sm:$0xff] }
  0xce   : > { %1267 = vmatpush1.bf16.msra.mxu1 %v1266_v47  ;;  %v1284_v39 = vpack.c.bf16 %v810_v38, %v809_v36  ;;  %v813_v43 = vld [vmem:[#allocation16 + $0x30] sm:$0xff]  ;;  %v816_v47 = vld [vmem:[#allocation16 + $0x48] sm:$0xff]  ;;  %v819_v52 = vld [vmem:[#allocation16 + $0x60] sm:$0xff] }
  0xcf   : > { %1238 = vmatpush3.bf16.msra.mxu0 %v1237_v48  ;;  %1269 = vmatprep.subr.bf16.mxu1 %v1268_v50  ;;  %v1290_v45 = vpack.c.bf16 %v814_v44, %v813_v43  ;;  %v1293_v48 = vpack.c.bf16 %v816_v47, %v815_v46  ;;  %v817_v49 = vld [vmem:[#allocation16 + $0x50] sm:$0xff]  ;;  %v818_v50 = vld [vmem:[#allocation16 + $0x58] sm:$0xff]  ;;  %v820_v53 = vld [vmem:[#allocation16 + $0x68] sm:$0xff] }
  0xd0   : > { %1239 = vmatprep.subr.bf16.mxu0 %v1670_v0  ;;  %v1296_v51 = vpack.c.bf16 %v818_v50, %v817_v49  ;;  %v1299_v54 = vpack.c.bf16 %v820_v53, %v819_v52  ;;  %v821_v55 = vld [vmem:[#allocation16 + $0x70] sm:$0xff]  ;;  %v704_v58 = vld [vmem:[#allocation6] sm:$0xff] }
  0xd2   : > { %1271 = vmatpush1.bf16.msra.mxu1 %v1270_v56  ;;  %v822_v56 = vld [vmem:[#allocation16 + $0x78] sm:$0xff] }
  0xd3   : > { %1241 = vmatpush3.bf16.msra.mxu0 %v1240_v57  ;;  %1273 = vmatprep.subr.bf16.mxu1 %v1272_v59  ;;  %v1302_v57 = vpack.c.bf16 %v822_v56, %v821_v55 }
  0xd4   : > { %1242 = vmatprep.subr.bf16.mxu0 %v1670_v0 }
  0xd6   : > { %1275 = vmatpush1.bf16.msra.mxu1 %v1274_v3 }
  0xd7   : > { %1244 = vmatpush3.bf16.msra.mxu0 %v1243_v4  ;;  %1277 = vmatprep.subr.bf16.mxu1 %v1276_v6 }
  0xd8   : > { %1245 = vmatprep.subr.bf16.mxu0 %v1670_v0 }
  0xda   : > { %1279 = vmatpush1.bf16.msra.mxu1 %v1278_v10 }
  0xdb   : > { %1247 = vmatpush3.bf16.msra.mxu0 %v1246_v11  ;;  %1179 = vmatprep.subr.mxu1 %v1671_v1 }
  0xdc   : > { %1280 = vmatprep.subr.bf16.mxu0 %v1670_v0 }
  0xdd   : > { %600 = vmatmul.mubr.f32.vlgmr.msra.gmra.mrb[0].mxu1 %v502_v12 }
  0xde   : > { %1177 = vmatmul.mubr.f32.vlgmr.msra.gmra.mrb[0].mxu0 %v1996_v13  ;;  %1181 = vmatprep.mubr.msk.f32.mxu1 %vm1672_vm0, %v1671_v1 }
  0xdf   : > { %1221 = vmatprep.mubr.msk.f32.mxu0 %vm1672_vm0, %v1671_v1  ;;  %1282 = vmatpush3.bf16.msra.mxu0 %v1281_v37 }
  0xe0   : > { %1283 = vmatprep.subr.bf16.mxu0 %v1670_v0 }
  0xe3   : > { %1285 = vmatpush3.bf16.msra.mxu0 %v1284_v39 }
  0xe4   : > { %1286 = vmatprep.subr.bf16.mxu0 %v1670_v0 }
  0xe7   : > { %1288 = vmatpush3.bf16.msra.mxu0 %v1287_v42 }
  0xe8   : > { %1289 = vmatprep.subr.bf16.mxu0 %v1670_v0 }
  0xeb   : > { %1291 = vmatpush3.bf16.msra.mxu0 %v1290_v45 }
  0xec   : > { %1292 = vmatprep.subr.bf16.mxu0 %v1670_v0 }
  0xef   : > { %1294 = vmatpush3.bf16.msra.mxu0 %v1293_v48 }
  0xf0   : > { %1295 = vmatprep.subr.bf16.mxu0 %v1670_v0 }
  0xf3   : > { %1297 = vmatpush3.bf16.msra.mxu0 %v1296_v51 }
  0xf4   : > { %1298 = vmatprep.subr.bf16.mxu0 %v1670_v0 }
  0xf7   : > { %1300 = vmatpush3.bf16.msra.mxu0 %v1299_v54 }
  0xf8   : > { %1301 = vmatprep.subr.bf16.mxu0 %v1670_v0 }
  0xfb   : > { %1303 = vmatpush3.bf16.msra.mxu0 %v1302_v57 }
 0x1b0   : > { %v601_v14 = vpop.f32.mrb[0].mxu1 }
 0x1b1   : > { %v488_v15 = vpop.f32.mrb[0].mxu0  ;;  %v603_v17 = vpop.f32.mrb[1].mxu1  ;;  %1180 = vmatpush3.xpose.msra.mxu1 %v601_v14 }
 0x1b2   : > { %v492_v16 = vmul.f32 0.088388346, %v488_v15  ;;  %v1178_v18 = vpop.f32.mrb[1].mxu0  ;;  %1184 = vmatprep.subr.mxu1 %v1671_v1 }
 0x1b4   : > { %1182 = vmatmul.mubr.f32.vlgmr.msra.gmra.mrb[2].mxu1 %v492_v16 }
 0x1b5   : > { %1185 = vmatpush3.msra.mxu1 %v603_v17  ;;  %1186 = vmatprep.mubr.msk.f32.mxu1 %vm1672_vm0, %v1671_v1 }
 0x287   : > { %v683_v20 = vpop.f32.mrb[2].mxu1 }
 0x288   : > { %v1183_v21 = vpop.f32.mrb[3].mxu1  ;;  %v689_v22 = vsel %vm688_vm2, %v683_v20, -inf }
 0x289   : > { %690 = vmax.xlane.f32.xlu0 %v689_v22  ;;  %v1101_v21 = vld [vmem:[%s2090_s6] ss:$0 sm:$0xff] }
 0x316   : > { %v691_v25 = vpop.xlane.xlu0 %690 }
 0x317   : > { %v692_v26 = vmax.f32 %v687_v24, %v691_v25 }
 0x319   : > { %v693_v27 = vsub.f32 %v687_v24, %v692_v26  ;;  %794 = vst.msk [vmem:[#allocation5] sm:$0xff] %vm494_vm1, %v692_v26  ;;  %698 = vperm.xlu0 %1411, %v692_v26  }
 0x31b   : > { %v694_v32 = vmul.f32 1.442695, %v693_v27 }
 0x398   : > { %v699_v28 = vpop.permute.xlu0 %698 }
 0x399   : > { %v701_v29 = vsub.f32 %v683_v20, %v699_v28 }
 0x39b   : > { %v702_v30 = vmul.f32 1.442695, %v701_v29 }
 0x39d   : > { %1413 = vpow2.f32 %v702_v30 }
 0x39e   : > { %1415 = vpow2.f32 %v694_v32 }
 0x3a7   : > { %v1414_v1 = vpop.eup %1413 }
 0x3a8   : > { %1187 = vmatmul.mubr.msk.f32.vlgmr.msra.gmra.mrb[4].mxu1 %vm688_vm2, %v1414_v1  ;;  %v706_v31 = vsel %vm688_vm2, %v1414_v1, 0.0  ;;  %v1416_v33 = vpop.eup %1415 }
 0x3a9   : > { %707 = vadd.xlane.f32.xlu1 %v706_v31  ;;  %v705_v59 = vmul.f32 %v1416_v33, %v704_v58 }
 0x3ba   : > { %715 = vperm.xlu1 %1412, %v1416_v33  }
 0x436   : > { %v708_v60 = vpop.xlane.xlu1 %707 }
 0x437   : > { %v709_v61 = vadd.f32 %v708_v60, %v705_v59 }
 0x439   : > { %711 = vst.msk [vmem:[#allocation6] sm:$0xff] %vm494_vm1, %v709_v61 }
 0x43a   : > { %v716_v4 = vpop.permute.xlu1 %715 }
 0x43b   : > { %v718_v5 = vmul.f32 0.0, %v716_v4 }
 0x440   : > { %v799_v62 = vld [vmem:[#allocation6] sm:$0xff] }
 0x441   : > { %1417 = vrcp.f32 %v799_v62 }
 0x44b   : > { %v1418_v63 = vpop.eup %1417 }
 0x44c   : > { %803 = vperm.xlu1 %1412, %v1418_v63  }
 0x47b   : > { %v788_v2 = vpop.f32.mrb[4].mxu1 }
 0x47c   : > { %v1188_v3 = vpop.f32.mrb[5].mxu1  ;;  %v792_v6 = vadd.f32 %v788_v2, %v718_v5 }
 0x4cb   : > { %v804_v7 = vpop.permute.xlu1 %803 }
 0x4cc   : > { %v806_v8 = vmul.f32 %v804_v7, %v792_v6 }
 0x4ce   : > { %1222 = vmatmul.mubr.f32.vlgmr.msra.gmra.mrb[2].mxu0 %v806_v8 }
 0x5a1   : > { %v890_v0 = vpop.f32.mrb[2].mxu0 }
 0x5a2   : > { %v891_v9 = vadd.f32 %v890_v0, %v1996_v13  ;;  %v1223_v10 = vpop.f32.mrb[3].mxu0  ;;  %v1100_v13 = vld [vmem:[%s2089_s5] ss:$0 sm:$0xff] }
 0x5a4   : > { %894 = vadd.xlane.f32.xlu1 %v891_v9 }
 0x631   : > { %v895_v11 = vpop.xlane.xlu1 %894 }
 0x632   : > { %v897_v12 = vmul.f32 0.0078125, %v895_v11 }
 0x634   : > { %v898_v14 = vsub.f32 %v891_v9, %v897_v12 }
 0x636   : > { %v899_v15 = vmul.f32 %v898_v14, %v898_v14 }
 0x638   : > { %900 = vadd.xlane.f32.xlu0 %v899_v15 }
 0x6c5   : > { %v901_v16 = vpop.xlane.xlu0 %900 }
 0x6c6   : > { %v902_v17 = vmul.f32 0.0078125, %v901_v16 }
 0x6c8   : > { %v903_v18 = vadd.f32 1e-05, %v902_v17 }
 0x6ca   : > { %1419 = vrsqrt.f32 %v903_v18 }
 0x6d4   : > { %v1420_v19 = vpop.eup %1419 }
 0x6d5   : > { %v905_v20 = vmul.f32 %v1420_v19, %v898_v14 }
 0x6d7   : > { %v913_v22 = vmul.f32 %v1100_v13, %v905_v20 }
 0x6d9   : > { %v921_v23 = vadd.f32 %v1101_v21, %v913_v22 }
 0x6db   : > { %922 = vst [vmem:[%s400_s8] sm:$0xff] %v921_v23 }
 0x6dc   : > { %1578 = shalt.err (!%p1575_p11)
}
 0x6dd   : > { %s1579_s13 = scalar_lea.hbm %s2035_s16, 128  ;;  %s1583_s2 = scalar_lea.hbm %s2091_s7, 256 }
 0x6de   : > { %p1580_p6 = scmp.ne.s32.totalorder %s2035_s16, %s1579_s13  ;;  %p1584_p12 = scmp.lt.u32.totalorder %s2035_s16, %s2091_s7 }
 0x6df   : > { %p1585_p5 = scmp.lt.u32.totalorder %s1583_s2, %s1579_s13  ;;  %p1587_p0 = scmp.lt.u32.totalorder %s1579_s13, %s2035_s16 }
 0x6e0   : > { %p1581_p3 = pnand %p1580_p6, %p2127_p2 }
 0x6e1   : > { %p1586_p9 = por %p1585_p5, %p1584_p12 }
 0x6e2   : > { %p1582_p7 = pneg %p1581_p3 }
 0x6e3   : > { %p1588_p4 = por %p1587_p0, %p1586_p9 }
 0x6e5   : > { %p1589_p8 = pnand %p1588_p4, %p1582_p7 }
 0x6e7   : > { %1592 = shalt.err (!%p1589_p8)
}
 0x6e8   : > { %1320 = dma.vmem_to_hbm [thread:$0]  (%p2127_p2), %s2037_s14, 128, %s2035_s16, %s924_s18  }
 0x6e9 PF: > { %s2128_s9 = sld [smem:[#allocation23_spill]]  ;;  %s2129_s4 = sld [smem:[#allocation24_spill]] }
 0x6ea   : > { %p2131_p13 = scmp.ge.s32.totalorder %s1659_s29, 2 }
 0x6ef   : > { %s950_s24 = sand.u32 1, %s2128_s9   ;;  %p2130_p1 = scmp.ne.s32.totalorder %s2129_s4, 0 }
 0x6f0   : > { %s951_s20 = scalar_lea.sflag [#allocation10], %s950_s24 }
 0x6f1   : > { %p1340_p10 = pnand %p2131_p13, %p2130_p1 }
 0x6f3   : > { %1634 = dma.done.wait (!%p1340_p10), %s951_s20, 128  }
 0x6f4   : > { %1636 = vsyncadd (!%p1340_p10), %s951_s20, 4294967168  ;;  %s27_s29 = sadd.s32 1, %s1659_s29   ;;  %s2132_s10 = sld [smem:[#allocation25_spill]] }
 0x6f5   : > { %p24_p11 = scmp.ge.s32.totalorder %s27_s29, 4   ;;  %s2133_s24 = smov %s1643_s25 }
 0x6f6   : > { %s2134_s25 = smov %s1647_s26  ;;  %s2135_s26 = smov %s1883_s23 }
 0x6f7   : > { %s2136_s27 = smov %s1655_s28  ;;  %26 = sbr.rel (!%p24_p11) target bundleno = 13 (0xd), region = 134 }
 0x6fa   : > { %s2137_s28 = smov %s2132_s10 }
 0x6fe   :  { %956 = vsyncpa [#allocation9], 1 }
 0x6ff   :  { %958 = vsyncpa [#allocation9 + $0x1], 1 }
 0x700   :  { %959 = vsyncpa [#allocation12], 1 }
 0x701   :  { %961 = vsyncpa [#allocation12 + $0x1], 1 }
 0x702   :  { %962 = vsyncpa [#allocation15], 1 }
 0x703   :  { %963 = vsyncpa [#allocation10], 1 }
 0x704   :  { %965 = vsyncpa [#allocation10 + $0x1], 1 }

</bundles_post_ra>
